<compile_context>
chip_gen: v6e
topology: v6e:2x2x1
jax: 0.10.0
libtpu: 0.0.40
codegen_flags: <defaults>
</compile_context>

<pallas_src>
import functools

import jax
import jax.numpy as jnp
from jax.experimental import pallas as pl
from jax.experimental.pallas import tpu as pltpu


def _default_vmem_limit():
    """Per-generation VMEM budget: physical capacity minus ~8 MiB headroom."""
    try:
        cap = pltpu.get_tpu_info().vmem_capacity_bytes
    except Exception:
        cap = 64 * 1024 * 1024  # conservative fallback (v7x-sized)
    return min(cap - 8 * 1024 * 1024, 112 * 1024 * 1024)


_VMEM_LIMIT = _default_vmem_limit()


def _local_op_kernel(x_ref, w1_ref, w2_ref, bias_ref, o_ref):
    # x_ref   : (tile_bn, S*d_i) f32/bf16 -- lane-dense rows of (B*N, S*d_i)
    # w1_ref  : (d_i, d_o)       bf16     -- conv1 weight with BN1 scale folded
    # w2_ref  : (d_o, d_o)       bf16     -- conv2 weight with BN2 scale folded
    # bias_ref: (2, d_o)         f32      -- row 0 = BN1 bias, row 1 = BN2 bias
    # o_ref   : (d_o, tile_bn)   f32      -- lane-dense transposed output tile
    d_i, d_o = w1_ref.shape
    s = x_ref.shape[1] // d_i

    w1 = w1_ref[...]
    w2 = w2_ref[...]
    b1 = bias_ref[0:1, :]
    b2 = bias_ref[1:2, :]

    def one_sample(k):
        # Static lane slice of the resident x tile; cast to bf16 only at the MXU.
        xk = x_ref[:, k * d_i:(k + 1) * d_i].astype(jnp.bfloat16)
        # conv1 (1x1) + BN1 + ReLU   (MXU matmul, f32 accumulate / elementwise)
        h1 = jnp.dot(xk, w1, preferred_element_type=jnp.float32)
        h1 = jnp.maximum(h1 + b1, 0.0)
        # conv2 (1x1) + BN2 + ReLU
        h2 = jnp.dot(h1.astype(jnp.bfloat16), w2,
                     preferred_element_type=jnp.float32)
        return jnp.maximum(h2 + b2, 0.0)

    # adaptive_max_pool1d(1) as a running elementwise max over the S samples.
    # All values are post-ReLU (>= 0), so the running max equals the pool.
    acc = one_sample(0)
    for k in range(1, s):
        acc = jnp.maximum(acc, one_sample(k))

    # Transpose on the XLU so the store is full lane width (tile_bn multiple
    # of 128 -> unmasked vst) and the pooled result is lane-dense in HBM.
    o_ref[...] = jnp.transpose(acc, (1, 0))                   # (d_o, tile_bn)


@functools.partial(jax.jit, static_argnames=("tile_bn",))
def local_op(x, w1, w2, bn1_scale, bn1_bias, bn2_scale, bn2_bias, *,
             tile_bn=512):
    """x: (B, N, S, d_i) float32 (or bfloat16) -> (B, d_o, N) float32.

    w1: (d_o, d_i), w2: (d_o, d_o) -- PyTorch Conv1d weights (kernel dim
    squeezed).  bn*_scale / bn*_bias are the eval-mode BatchNorm fold:
    scale = gamma / sqrt(var + eps), bias = beta - mean * scale.
    """
    B, N, S, d_i = x.shape
    d_o = w1.shape[0]
    bn = B * N

    # Row tile: multiple of 128 (lane-dense transposed output, unmasked stores)
    # and capped at ceil(bn/2) so the grid keeps >= 2 steps (v7x has 2 TCs).
    # Tiny inputs fall back to a single full-width block (lane dim == array).
    half = (bn + 1) // 2
    cap = (min(int(tile_bn), half) // 128) * 128
    tb = cap if cap >= 128 else bn

    # Lane-dense, copy-free view of x: (B*N, S*d_i).  Contiguous reshape -- no
    # pad pass, no dtype-cast pass; the kernel streams x straight from HBM.
    xf = x.reshape(bn, S * d_i)

    # Conv1d weights (out, in) -> (in, out); fold the BN scale into the weight
    # columns so only bias + ReLU remain elementwise in the kernel.
    w1_t = (jnp.transpose(w1, (1, 0)) * bn1_scale[None, :]).astype(jnp.bfloat16)
    w2_t = (jnp.transpose(w2, (1, 0)) * bn2_scale[None, :]).astype(jnp.bfloat16)
    bias = jnp.stack([bn1_bias, bn2_bias], axis=0).astype(jnp.float32)  # (2,d_o)

    grid = (pl.cdiv(bn, tb),)
    out = pl.pallas_call(
        _local_op_kernel,
        out_shape=jax.ShapeDtypeStruct((d_o, bn), jnp.float32),
        grid_spec=pl.GridSpec(
            grid=grid,
            in_specs=[
                pl.BlockSpec((tb, S * d_i), lambda i: (i, 0)),
                pl.BlockSpec((d_i, d_o), lambda i: (0, 0)),
                pl.BlockSpec((d_o, d_o), lambda i: (0, 0)),
                pl.BlockSpec((2, d_o), lambda i: (0, 0)),
            ],
            out_specs=pl.BlockSpec((d_o, tb), lambda i: (0, i)),
        ),
        compiler_params=pltpu.CompilerParams(
            dimension_semantics=("parallel",),
            vmem_limit_bytes=_VMEM_LIMIT,
        ),
    )(xf, w1_t, w2_t, bias)

    # Tiny pooled output: lay out as (B, d_o, N) in XLA.
    out = out.reshape(d_o, B, N)
    return jnp.transpose(out, (1, 0, 2))


def _reference(x, w1, w2, s1, b1, s2, b2):
    """Pure-JAX f32 reference matching the PyTorch forward (BN eval mode)."""
    h = jnp.einsum("bnsd,od->bnso", x, w1)
    h = jnp.maximum(h * s1 + b1, 0.0)
    h = jnp.einsum("bnsd,od->bnso", h, w2)
    h = jnp.maximum(h * s2 + b2, 0.0)
    h = jnp.max(h, axis=2)                 # (B, N, d_o)
    return jnp.transpose(h, (0, 2, 1))     # (B, d_o, N)


if __name__ == "__main__":
    B, N, S, d_i, d_o = 2, 16, 8, 16, 32
    eps = 1e-5

    key = jax.random.PRNGKey(0)
    kx, k1, k2, kg1, kb1, km1, kv1, kg2, kb2, km2, kv2 = jax.random.split(key, 11)

    x = jax.random.normal(kx, (B, N, S, d_i), dtype=jnp.float32)

    # Conv1d weights (out, in), kernel_size=1 squeezed; deterministic init.
    w1 = jax.random.normal(k1, (d_o, d_i), dtype=jnp.float32) * 0.1
    w2 = jax.random.normal(k2, (d_o, d_o), dtype=jnp.float32) * 0.1

    # BatchNorm1d parameters (eval mode; folded into scale/bias).
    g1 = 1.0 + 0.1 * jax.random.normal(kg1, (d_o,), dtype=jnp.float32)
    be1 = 0.1 * jax.random.normal(kb1, (d_o,), dtype=jnp.float32)
    m1 = 0.1 * jax.random.normal(km1, (d_o,), dtype=jnp.float32)
    v1 = 1.0 + 0.1 * jax.nn.softplus(jax.random.normal(kv1, (d_o,), dtype=jnp.float32))
    g2 = 1.0 + 0.1 * jax.random.normal(kg2, (d_o,), dtype=jnp.float32)
    be2 = 0.1 * jax.random.normal(kb2, (d_o,), dtype=jnp.float32)
    m2 = 0.1 * jax.random.normal(km2, (d_o,), dtype=jnp.float32)
    v2 = 1.0 + 0.1 * jax.nn.softplus(jax.random.normal(kv2, (d_o,), dtype=jnp.float32))

    s1 = g1 / jnp.sqrt(v1 + eps)
    b1 = be1 - m1 * s1
    s2 = g2 / jnp.sqrt(v2 + eps)
    b2 = be2 - m2 * s2

    out = local_op(x, w1, w2, s1, b1, s2, b2)
    out = jax.block_until_ready(out)

    ref = _reference(x, w1, w2, s1, b1, s2, b2)
    assert out.shape == (B, d_o, N), out.shape
    # bf16 matmul operands (f32 accumulation) -> loosened tolerance vs f32 ref.
    assert jnp.allclose(out, ref, atol=2e-2, rtol=2e-2), \
        float(jnp.max(jnp.abs(out - ref)))

    print("KERNEL_OK")
</pallas_src>

<mosaic_0001>
module attributes {stable_mosaic.version = 11 : i64} {
  func.func @_local_op_kernel(%arg0: i32, %arg1: memref<32x128xf32, #tpu.memory_space<vmem>>, %arg2: memref<16x32xbf16, #tpu.memory_space<vmem>>, %arg3: memref<32x32xbf16, #tpu.memory_space<vmem>>, %arg4: memref<2x32xf32, #tpu.memory_space<vmem>>, %arg5: memref<32x32xf32, #tpu.memory_space<vmem>>) attributes {dimension_semantics = [#tpu.dimension_semantics<parallel>], iteration_bounds = array<i64: 1>, scalar_prefetch = 0 : i64, scratch_operands = 0 : i64, tpu.core_type = #tpu.core_type<tc>, window_params = [{transform_indices = @transform_0, window_bounds = array<i64: 32, 128>}, {pipeline_mode = #tpu.pipeline_mode<synchronous>, transform_indices = @transform_1, window_bounds = array<i64: 16, 32>}, {pipeline_mode = #tpu.pipeline_mode<synchronous>, transform_indices = @transform_2, window_bounds = array<i64: 32, 32>}, {pipeline_mode = #tpu.pipeline_mode<synchronous>, transform_indices = @transform_3, window_bounds = array<i64: 2, 32>}, {transform_indices = @transform_4, window_bounds = array<i64: 32, 32>}]} {
    %c0 = arith.constant 0 : index
    %c0_0 = arith.constant 0 : index
    %0 = vector.load %arg2[%c0, %c0_0] : memref<16x32xbf16, #tpu.memory_space<vmem>>, vector<16x32xbf16>
    %c0_1 = arith.constant 0 : index
    %c0_2 = arith.constant 0 : index
    %1 = vector.load %arg3[%c0_1, %c0_2] : memref<32x32xbf16, #tpu.memory_space<vmem>>, vector<32x32xbf16>
    %c0_3 = arith.constant 0 : index
    %c0_4 = arith.constant 0 : index
    %2 = vector.load %arg4[%c0_3, %c0_4] : memref<2x32xf32, #tpu.memory_space<vmem>>, vector<1x32xf32>
    %c1 = arith.constant 1 : index
    %c0_5 = arith.constant 0 : index
    %3 = vector.load %arg4[%c1, %c0_5] : memref<2x32xf32, #tpu.memory_space<vmem>>, vector<1x32xf32>
    %c0_6 = arith.constant 0 : index
    %c0_7 = arith.constant 0 : index
    %4 = vector.load %arg1[%c0_6, %c0_7] : memref<32x128xf32, #tpu.memory_space<vmem>>, vector<32x16xf32>
    %5 = arith.truncf %4 : vector<32x16xf32> to vector<32x16xbf16>
    %cst = arith.constant dense<0.000000e+00> : vector<32x32xf32>
    %6 = tpu.matmul %5, %0, %cst {dimension_numbers = #tpu.dot_dimension_numbers<[1], [0], [0], [1], [0, 0, 1, 1], [], []>} : vector<32x16xbf16>, vector<16x32xbf16>, vector<32x32xf32> -> vector<32x32xf32>
    %7 = vector.broadcast %2 : vector<1x32xf32> to vector<32x32xf32>
    %8 = arith.addf %6, %7 : vector<32x32xf32>
    %cst_8 = arith.constant 0.000000e+00 : f32
    %9 = vector.broadcast %cst_8 : f32 to vector<32x32xf32>
    %10 = arith.maximumf %8, %9 : vector<32x32xf32>
    %11 = arith.truncf %10 : vector<32x32xf32> to vector<32x32xbf16>
    %cst_9 = arith.constant dense<0.000000e+00> : vector<32x32xf32>
    %12 = tpu.matmul %11, %1, %cst_9 {dimension_numbers = #tpu.dot_dimension_numbers<[1], [0], [0], [1], [0, 0, 1, 1], [], []>} : vector<32x32xbf16>, vector<32x32xbf16>, vector<32x32xf32> -> vector<32x32xf32>
    %13 = vector.broadcast %3 : vector<1x32xf32> to vector<32x32xf32>
    %14 = arith.addf %12, %13 : vector<32x32xf32>
    %cst_10 = arith.constant 0.000000e+00 : f32
    %15 = vector.broadcast %cst_10 : f32 to vector<32x32xf32>
    %16 = arith.maximumf %14, %15 : vector<32x32xf32>
    %c0_11 = arith.constant 0 : index
    %c16 = arith.constant 16 : index
    %17 = vector.load %arg1[%c0_11, %c16] : memref<32x128xf32, #tpu.memory_space<vmem>>, vector<32x16xf32>
    %18 = arith.truncf %17 : vector<32x16xf32> to vector<32x16xbf16>
    %cst_12 = arith.constant dense<0.000000e+00> : vector<32x32xf32>
    %19 = tpu.matmul %18, %0, %cst_12 {dimension_numbers = #tpu.dot_dimension_numbers<[1], [0], [0], [1], [0, 0, 1, 1], [], []>} : vector<32x16xbf16>, vector<16x32xbf16>, vector<32x32xf32> -> vector<32x32xf32>
    %20 = vector.broadcast %2 : vector<1x32xf32> to vector<32x32xf32>
    %21 = arith.addf %19, %20 : vector<32x32xf32>
    %cst_13 = arith.constant 0.000000e+00 : f32
    %22 = vector.broadcast %cst_13 : f32 to vector<32x32xf32>
    %23 = arith.maximumf %21, %22 : vector<32x32xf32>
    %24 = arith.truncf %23 : vector<32x32xf32> to vector<32x32xbf16>
    %cst_14 = arith.constant dense<0.000000e+00> : vector<32x32xf32>
    %25 = tpu.matmul %24, %1, %cst_14 {dimension_numbers = #tpu.dot_dimension_numbers<[1], [0], [0], [1], [0, 0, 1, 1], [], []>} : vector<32x32xbf16>, vector<32x32xbf16>, vector<32x32xf32> -> vector<32x32xf32>
    %26 = vector.broadcast %3 : vector<1x32xf32> to vector<32x32xf32>
    %27 = arith.addf %25, %26 : vector<32x32xf32>
    %cst_15 = arith.constant 0.000000e+00 : f32
    %28 = vector.broadcast %cst_15 : f32 to vector<32x32xf32>
    %29 = arith.maximumf %27, %28 : vector<32x32xf32>
    %30 = arith.maximumf %16, %29 : vector<32x32xf32>
    %c0_16 = arith.constant 0 : index
    %c32 = arith.constant 32 : index
    %31 = vector.load %arg1[%c0_16, %c32] : memref<32x128xf32, #tpu.memory_space<vmem>>, vector<32x16xf32>
    %32 = arith.truncf %31 : vector<32x16xf32> to vector<32x16xbf16>
    %cst_17 = arith.constant dense<0.000000e+00> : vector<32x32xf32>
    %33 = tpu.matmul %32, %0, %cst_17 {dimension_numbers = #tpu.dot_dimension_numbers<[1], [0], [0], [1], [0, 0, 1, 1], [], []>} : vector<32x16xbf16>, vector<16x32xbf16>, vector<32x32xf32> -> vector<32x32xf32>
    %34 = vector.broadcast %2 : vector<1x32xf32> to vector<32x32xf32>
    %35 = arith.addf %33, %34 : vector<32x32xf32>
    %cst_18 = arith.constant 0.000000e+00 : f32
    %36 = vector.broadcast %cst_18 : f32 to vector<32x32xf32>
    %37 = arith.maximumf %35, %36 : vector<32x32xf32>
    %38 = arith.truncf %37 : vector<32x32xf32> to vector<32x32xbf16>
    %cst_19 = arith.constant dense<0.000000e+00> : vector<32x32xf32>
    %39 = tpu.matmul %38, %1, %cst_19 {dimension_numbers = #tpu.dot_dimension_numbers<[1], [0], [0], [1], [0, 0, 1, 1], [], []>} : vector<32x32xbf16>, vector<32x32xbf16>, vector<32x32xf32> -> vector<32x32xf32>
    %40 = vector.broadcast %3 : vector<1x32xf32> to vector<32x32xf32>
    %41 = arith.addf %39, %40 : vector<32x32xf32>
    %cst_20 = arith.constant 0.000000e+00 : f32
    %42 = vector.broadcast %cst_20 : f32 to vector<32x32xf32>
    %43 = arith.maximumf %41, %42 : vector<32x32xf32>
    %44 = arith.maximumf %30, %43 : vector<32x32xf32>
    %c0_21 = arith.constant 0 : index
    %c48 = arith.constant 48 : index
    %45 = vector.load %arg1[%c0_21, %c48] : memref<32x128xf32, #tpu.memory_space<vmem>>, vector<32x16xf32>
    %46 = arith.truncf %45 : vector<32x16xf32> to vector<32x16xbf16>
    %cst_22 = arith.constant dense<0.000000e+00> : vector<32x32xf32>
    %47 = tpu.matmul %46, %0, %cst_22 {dimension_numbers = #tpu.dot_dimension_numbers<[1], [0], [0], [1], [0, 0, 1, 1], [], []>} : vector<32x16xbf16>, vector<16x32xbf16>, vector<32x32xf32> -> vector<32x32xf32>
    %48 = vector.broadcast %2 : vector<1x32xf32> to vector<32x32xf32>
    %49 = arith.addf %47, %48 : vector<32x32xf32>
    %cst_23 = arith.constant 0.000000e+00 : f32
    %50 = vector.broadcast %cst_23 : f32 to vector<32x32xf32>
    %51 = arith.maximumf %49, %50 : vector<32x32xf32>
    %52 = arith.truncf %51 : vector<32x32xf32> to vector<32x32xbf16>
    %cst_24 = arith.constant dense<0.000000e+00> : vector<32x32xf32>
    %53 = tpu.matmul %52, %1, %cst_24 {dimension_numbers = #tpu.dot_dimension_numbers<[1], [0], [0], [1], [0, 0, 1, 1], [], []>} : vector<32x32xbf16>, vector<32x32xbf16>, vector<32x32xf32> -> vector<32x32xf32>
    %54 = vector.broadcast %3 : vector<1x32xf32> to vector<32x32xf32>
    %55 = arith.addf %53, %54 : vector<32x32xf32>
    %cst_25 = arith.constant 0.000000e+00 : f32
    %56 = vector.broadcast %cst_25 : f32 to vector<32x32xf32>
    %57 = arith.maximumf %55, %56 : vector<32x32xf32>
    %58 = arith.maximumf %44, %57 : vector<32x32xf32>
    %c0_26 = arith.constant 0 : index
    %c64 = arith.constant 64 : index
    %59 = vector.load %arg1[%c0_26, %c64] : memref<32x128xf32, #tpu.memory_space<vmem>>, vector<32x16xf32>
    %60 = arith.truncf %59 : vector<32x16xf32> to vector<32x16xbf16>
    %cst_27 = arith.constant dense<0.000000e+00> : vector<32x32xf32>
    %61 = tpu.matmul %60, %0, %cst_27 {dimension_numbers = #tpu.dot_dimension_numbers<[1], [0], [0], [1], [0, 0, 1, 1], [], []>} : vector<32x16xbf16>, vector<16x32xbf16>, vector<32x32xf32> -> vector<32x32xf32>
    %62 = vector.broadcast %2 : vector<1x32xf32> to vector<32x32xf32>
    %63 = arith.addf %61, %62 : vector<32x32xf32>
    %cst_28 = arith.constant 0.000000e+00 : f32
    %64 = vector.broadcast %cst_28 : f32 to vector<32x32xf32>
    %65 = arith.maximumf %63, %64 : vector<32x32xf32>
    %66 = arith.truncf %65 : vector<32x32xf32> to vector<32x32xbf16>
    %cst_29 = arith.constant dense<0.000000e+00> : vector<32x32xf32>
    %67 = tpu.matmul %66, %1, %cst_29 {dimension_numbers = #tpu.dot_dimension_numbers<[1], [0], [0], [1], [0, 0, 1, 1], [], []>} : vector<32x32xbf16>, vector<32x32xbf16>, vector<32x32xf32> -> vector<32x32xf32>
    %68 = vector.broadcast %3 : vector<1x32xf32> to vector<32x32xf32>
    %69 = arith.addf %67, %68 : vector<32x32xf32>
    %cst_30 = arith.constant 0.000000e+00 : f32
    %70 = vector.broadcast %cst_30 : f32 to vector<32x32xf32>
    %71 = arith.maximumf %69, %70 : vector<32x32xf32>
    %72 = arith.maximumf %58, %71 : vector<32x32xf32>
    %c0_31 = arith.constant 0 : index
    %c80 = arith.constant 80 : index
    %73 = vector.load %arg1[%c0_31, %c80] : memref<32x128xf32, #tpu.memory_space<vmem>>, vector<32x16xf32>
    %74 = arith.truncf %73 : vector<32x16xf32> to vector<32x16xbf16>
    %cst_32 = arith.constant dense<0.000000e+00> : vector<32x32xf32>
    %75 = tpu.matmul %74, %0, %cst_32 {dimension_numbers = #tpu.dot_dimension_numbers<[1], [0], [0], [1], [0, 0, 1, 1], [], []>} : vector<32x16xbf16>, vector<16x32xbf16>, vector<32x32xf32> -> vector<32x32xf32>
    %76 = vector.broadcast %2 : vector<1x32xf32> to vector<32x32xf32>
    %77 = arith.addf %75, %76 : vector<32x32xf32>
    %cst_33 = arith.constant 0.000000e+00 : f32
    %78 = vector.broadcast %cst_33 : f32 to vector<32x32xf32>
    %79 = arith.maximumf %77, %78 : vector<32x32xf32>
    %80 = arith.truncf %79 : vector<32x32xf32> to vector<32x32xbf16>
    %cst_34 = arith.constant dense<0.000000e+00> : vector<32x32xf32>
    %81 = tpu.matmul %80, %1, %cst_34 {dimension_numbers = #tpu.dot_dimension_numbers<[1], [0], [0], [1], [0, 0, 1, 1], [], []>} : vector<32x32xbf16>, vector<32x32xbf16>, vector<32x32xf32> -> vector<32x32xf32>
    %82 = vector.broadcast %3 : vector<1x32xf32> to vector<32x32xf32>
    %83 = arith.addf %81, %82 : vector<32x32xf32>
    %cst_35 = arith.constant 0.000000e+00 : f32
    %84 = vector.broadcast %cst_35 : f32 to vector<32x32xf32>
    %85 = arith.maximumf %83, %84 : vector<32x32xf32>
    %86 = arith.maximumf %72, %85 : vector<32x32xf32>
    %c0_36 = arith.constant 0 : index
    %c96 = arith.constant 96 : index
    %87 = vector.load %arg1[%c0_36, %c96] : memref<32x128xf32, #tpu.memory_space<vmem>>, vector<32x16xf32>
    %88 = arith.truncf %87 : vector<32x16xf32> to vector<32x16xbf16>
    %cst_37 = arith.constant dense<0.000000e+00> : vector<32x32xf32>
    %89 = tpu.matmul %88, %0, %cst_37 {dimension_numbers = #tpu.dot_dimension_numbers<[1], [0], [0], [1], [0, 0, 1, 1], [], []>} : vector<32x16xbf16>, vector<16x32xbf16>, vector<32x32xf32> -> vector<32x32xf32>
    %90 = vector.broadcast %2 : vector<1x32xf32> to vector<32x32xf32>
    %91 = arith.addf %89, %90 : vector<32x32xf32>
    %cst_38 = arith.constant 0.000000e+00 : f32
    %92 = vector.broadcast %cst_38 : f32 to vector<32x32xf32>
    %93 = arith.maximumf %91, %92 : vector<32x32xf32>
    %94 = arith.truncf %93 : vector<32x32xf32> to vector<32x32xbf16>
    %cst_39 = arith.constant dense<0.000000e+00> : vector<32x32xf32>
    %95 = tpu.matmul %94, %1, %cst_39 {dimension_numbers = #tpu.dot_dimension_numbers<[1], [0], [0], [1], [0, 0, 1, 1], [], []>} : vector<32x32xbf16>, vector<32x32xbf16>, vector<32x32xf32> -> vector<32x32xf32>
    %96 = vector.broadcast %3 : vector<1x32xf32> to vector<32x32xf32>
    %97 = arith.addf %95, %96 : vector<32x32xf32>
    %cst_40 = arith.constant 0.000000e+00 : f32
    %98 = vector.broadcast %cst_40 : f32 to vector<32x32xf32>
    %99 = arith.maximumf %97, %98 : vector<32x32xf32>
    %100 = arith.maximumf %86, %99 : vector<32x32xf32>
    %c0_41 = arith.constant 0 : index
    %c112 = arith.constant 112 : index
    %101 = vector.load %arg1[%c0_41, %c112] : memref<32x128xf32, #tpu.memory_space<vmem>>, vector<32x16xf32>
    %102 = arith.truncf %101 : vector<32x16xf32> to vector<32x16xbf16>
    %cst_42 = arith.constant dense<0.000000e+00> : vector<32x32xf32>
    %103 = tpu.matmul %102, %0, %cst_42 {dimension_numbers = #tpu.dot_dimension_numbers<[1], [0], [0], [1], [0, 0, 1, 1], [], []>} : vector<32x16xbf16>, vector<16x32xbf16>, vector<32x32xf32> -> vector<32x32xf32>
    %104 = vector.broadcast %2 : vector<1x32xf32> to vector<32x32xf32>
    %105 = arith.addf %103, %104 : vector<32x32xf32>
    %cst_43 = arith.constant 0.000000e+00 : f32
    %106 = vector.broadcast %cst_43 : f32 to vector<32x32xf32>
    %107 = arith.maximumf %105, %106 : vector<32x32xf32>
    %108 = arith.truncf %107 : vector<32x32xf32> to vector<32x32xbf16>
    %cst_44 = arith.constant dense<0.000000e+00> : vector<32x32xf32>
    %109 = tpu.matmul %108, %1, %cst_44 {dimension_numbers = #tpu.dot_dimension_numbers<[1], [0], [0], [1], [0, 0, 1, 1], [], []>} : vector<32x32xbf16>, vector<32x32xbf16>, vector<32x32xf32> -> vector<32x32xf32>
    %110 = vector.broadcast %3 : vector<1x32xf32> to vector<32x32xf32>
    %111 = arith.addf %109, %110 : vector<32x32xf32>
    %cst_45 = arith.constant 0.000000e+00 : f32
    %112 = vector.broadcast %cst_45 : f32 to vector<32x32xf32>
    %113 = arith.maximumf %111, %112 : vector<32x32xf32>
    %114 = arith.maximumf %100, %113 : vector<32x32xf32>
    %115 = tpu.transpose %114, [1, 0] : vector<32x32xf32> -> vector<32x32xf32>
    %c0_46 = arith.constant 0 : index
    %c0_47 = arith.constant 0 : index
    %116 = vector.load %arg5[%c0_46, %c0_47] : memref<32x32xf32, #tpu.memory_space<vmem>>, vector<32x32xf32>
    tpu.vector_store %arg5[%c0_46, %c0_47], %115 {strides = array<i32>} : memref<32x32xf32, #tpu.memory_space<vmem>>, vector<32x32xf32>,
    return
  }
  func.func @transform_0(%arg0: i32) -> (i32, i32) {
    %c0_i32 = arith.constant 0 : i32
    %c0_i32_0 = arith.constant 0 : i32
    return %arg0, %c0_i32 : i32, i32
  }
  func.func @transform_1(%arg0: i32) -> (i32, i32) {
    %c0_i32 = arith.constant 0 : i32
    %c0_i32_0 = arith.constant 0 : i32
    %c0_i32_1 = arith.constant 0 : i32
    return %c0_i32, %c0_i32_0 : i32, i32
  }
  func.func @transform_2(%arg0: i32) -> (i32, i32) {
    %c0_i32 = arith.constant 0 : i32
    %c0_i32_0 = arith.constant 0 : i32
    %c0_i32_1 = arith.constant 0 : i32
    return %c0_i32, %c0_i32_0 : i32, i32
  }
  func.func @transform_3(%arg0: i32) -> (i32, i32) {
    %c0_i32 = arith.constant 0 : i32
    %c0_i32_0 = arith.constant 0 : i32
    %c0_i32_1 = arith.constant 0 : i32
    return %c0_i32, %c0_i32_0 : i32, i32
  }
  func.func @transform_4(%arg0: i32) -> (i32, i32) {
    %c0_i32 = arith.constant 0 : i32
    %c0_i32_0 = arith.constant 0 : i32
    return %c0_i32, %arg0 : i32, i32
  }
}

</mosaic_0001>

<bundles_post_ra>
// kernel: local_op.1
= control target key start
LH: loop header
LB: loop body
LE: loop exit
PB: predicated region body
PF: predicated region fallthrough
CT: control target
= control target key end

     0   :  { %vm42_vm0 = vcmask 130048   ;;  %s1334_s25 = smov 112   ;;  %s1335_s26 = smov 96   ;;  %vm120_vm1 = vcmask 261120   ;;  %s1572_s0 = inlined_call_operand.vmem [shape: f32[32,128], index: 0, kind: input, shape index: {}]   ;;  %s1573_s1 = inlined_call_operand.vmem [shape: bf16[16,32], index: 1, kind: input, shape index: {}]   ;;  %s1574_s2 = inlined_call_operand.vmem [shape: bf16[32,32], index: 2, kind: input, shape index: {}]   ;;  %s1575_s3 = inlined_call_operand.vmem [shape: f32[2,32], index: 3, kind: input, shape index: {}]   ;;  %s1576_s4 = inlined_call_operand.vmem [shape: f32[32,32], index: 4, kind: output, shape index: {}]  }
   0x1   :  { %v26_v0 = vld [vmem:[%s1572_s0] sm:$0xff]  ;;  %v27_v1 = vld [vmem:[%s1572_s0 + $0x8] sm:$0xff]  ;;  %v28_v2 = vld [vmem:[%s1572_s0 + $0x10] sm:$0xff]  ;;  %s1338_s27 = smov 48   ;;  %s1339_s28 = smov 32  }
   0x2   :  { %v30_v3 = vpack.c.bf16 %v27_v1, %v26_v0  ;;  %v29_v4 = vld [vmem:[%s1572_s0 + $0x18] sm:$0xff]  ;;  %v1381_v5 = vld [vmem:[%s1573_s1] sm:$0xff]   ;;  %s1336_s0 = smov 80   ;;  %s1337_s1 = smov 64   ;;  %v1393_v7 = vld [vmem:[%s1574_s2 + $0x8] sm:$0xff]  }
   0x3   :  { %v31_v6 = vpack.c.bf16 %v29_v4, %v28_v2  ;;  %1211 = vmatprep.subr.bf16.mxu0 %v1381_v5  ;;  %s1340_s29 = smov 16   ;;  %v1398_v8 = vld [vmem:[%s1574_s2] sm:$0xff]   ;;  %1217 = vmatprep.subr.bf16.mxu1 %v1393_v7 }
   0x4   :  { %182 = vrot.lane.b32.xlu0 %v30_v3, %s1334_s25  ;;  %310 = vrot.lane.b32.xlu1 %v30_v3, %s1335_s26  ;;  %v1433_v23 = vld [vmem:[%s1575_s3] ss:$0 sm:$0xff] }
   0x5   :  { %1213 = vmatprep.mubr.msk.bf16.mxu0 %vm42_vm0, %v30_v3  ;;  %1212 = vmatpush3.bf16.msra.mxu0 %v1381_v5 }
   0x6   :  { %1225 = vmatprep.subr.bf16.mxu0 %v1381_v5  ;;  %1218 = vmatpush3.bf16.msra.mxu1 %v1393_v7 }
   0x7   :  { %1219 = vmatprep.subr.bf16.mxu1 %v1398_v8 }
   0x8   :  { %184 = vrot.lane.b32.xlu0 %v31_v6, %s1334_s25  ;;  %312 = vrot.lane.b32.xlu1 %v31_v6, %s1335_s26 }
   0x9   :  { %1214 = vmatmul.mubr.msk.bf16.vlgmr.msra.gmra.mxu0 %vm42_vm0, %v31_v6 }
   0xa   :  { %1226 = vmatpush3.bf16.msra.mxu0 %v1381_v5  ;;  %1220 = vmatpush3.bf16.msra.mxu1 %v1398_v8 }
   0xb   :  { %1239 = vmatprep.subr.bf16.mxu0 %v1381_v5  ;;  %1231 = vmatprep.subr.bf16.mxu1 %v1393_v7 }
   0xc   :  { %438 = vrot.lane.b32.xlu0 %v30_v3, %s1336_s0  ;;  %440 = vrot.lane.b32.xlu1 %v31_v6, %s1336_s0 }
  0x10   :  { %566 = vrot.lane.b32.xlu0 %v30_v3, %s1337_s1  ;;  %568 = vrot.lane.b32.xlu1 %v31_v6, %s1337_s1 }
  0x14   :  { %694 = vrot.lane.b32.xlu0 %v30_v3, %s1338_s27  ;;  %696 = vrot.lane.b32.xlu1 %v31_v6, %s1338_s27 }
  0x18   :  { %822 = vrot.lane.b32.xlu0 %v30_v3, %s1339_s28  ;;  %824 = vrot.lane.b32.xlu1 %v31_v6, %s1339_s28 }
  0x1c   :  { %950 = vrot.lane.b32.xlu0 %v30_v3, %s1340_s29  ;;  %952 = vrot.lane.b32.xlu1 %v31_v6, %s1340_s29 }
  0x76   :  { %v183_v9 = vpop.permute.xlu0 %182  ;;  %v311_v10 = vpop.permute.xlu1 %310 }
  0x77   :  { %1227 = vmatprep.mubr.msk.bf16.mxu0 %vm42_vm0, %v183_v9 }
  0x7a   :  { %v185_v11 = vpop.permute.xlu0 %184  ;;  %v313_v12 = vpop.permute.xlu1 %312 }
  0x7b   :  { %1228 = vmatmul.mubr.msk.bf16.vlgmr.msra.gmra.mxu0 %vm42_vm0, %v185_v11 }
  0x7c   :  { %1240 = vmatpush3.bf16.msra.mxu0 %v1381_v5  ;;  %1241 = vmatprep.mubr.msk.bf16.mxu0 %vm42_vm0, %v311_v10 }
  0x7d   :  { %1253 = vmatprep.subr.bf16.mxu0 %v1381_v5 }
  0x7e   :  { %v439_v13 = vpop.permute.xlu0 %438  ;;  %v441_v14 = vpop.permute.xlu1 %440 }
  0x82   :  { %v567_v15 = vpop.permute.xlu0 %566  ;;  %v569_v16 = vpop.permute.xlu1 %568 }
  0x83   :  { %1242 = vmatmul.mubr.msk.bf16.vlgmr.msra.gmra.mxu0 %vm42_vm0, %v313_v12 }
  0x84   :  { %1254 = vmatpush3.bf16.msra.mxu0 %v1381_v5  ;;  %1255 = vmatprep.mubr.msk.bf16.mxu0 %vm42_vm0, %v439_v13 }
  0x85   :  { %1267 = vmatprep.subr.bf16.mxu0 %v1381_v5 }
  0x86   :  { %v695_v17 = vpop.permute.xlu0 %694  ;;  %v697_v18 = vpop.permute.xlu1 %696 }
  0x8a   :  { %v823_v19 = vpop.permute.xlu0 %822  ;;  %v825_v20 = vpop.permute.xlu1 %824 }
  0x8b   :  { %1256 = vmatmul.mubr.msk.bf16.vlgmr.msra.gmra.mxu0 %vm42_vm0, %v441_v14 }
  0x8c   :  { %1268 = vmatpush3.bf16.msra.mxu0 %v1381_v5  ;;  %1269 = vmatprep.mubr.msk.bf16.mxu0 %vm42_vm0, %v567_v15 }
  0x8d   :  { %1281 = vmatprep.subr.bf16.mxu0 %v1381_v5 }
  0x8e   :  { %v951_v21 = vpop.permute.xlu0 %950  ;;  %v953_v22 = vpop.permute.xlu1 %952 }
  0x93   :  { %1270 = vmatmul.mubr.msk.bf16.vlgmr.msra.gmra.mxu0 %vm42_vm0, %v569_v16 }
  0x94   :  { %1282 = vmatpush3.bf16.msra.mxu0 %v1381_v5  ;;  %1283 = vmatprep.mubr.msk.bf16.mxu0 %vm42_vm0, %v695_v17 }
  0x95   :  { %1295 = vmatprep.subr.bf16.mxu0 %v1381_v5 }
  0x9b   :  { %1284 = vmatmul.mubr.msk.bf16.vlgmr.msra.gmra.mxu0 %vm42_vm0, %v697_v18 }
  0x9c   :  { %1296 = vmatpush3.bf16.msra.mxu0 %v1381_v5  ;;  %1297 = vmatprep.mubr.msk.bf16.mxu0 %vm42_vm0, %v823_v19 }
  0x9d   :  { %1309 = vmatprep.subr.bf16.mxu0 %v1381_v5 }
  0xa3   :  { %1298 = vmatmul.mubr.msk.bf16.vlgmr.msra.gmra.mxu0 %vm42_vm0, %v825_v20 }
  0xa4   :  { %1310 = vmatpush3.bf16.msra.mxu0 %v1381_v5  ;;  %1311 = vmatprep.mubr.msk.bf16.mxu0 %vm42_vm0, %v951_v21 }
  0xab   :  { %1312 = vmatmul.mubr.msk.bf16.vlgmr.msra.gmra.mxu0 %vm42_vm0, %v953_v22 }
  0xc9   :  { %v1215_v24 = vpop.f32.mrf.mxu0 }
  0xca   :  { %v92_v25 = vadd.f32 %v1215_v24, %v1433_v23 }
  0xcb   :  { %v83_v26 = vpop.f32.mrf.mxu0 }
  0xcc   :  { %v84_v27 = vadd.f32 %v1433_v23, %v83_v26  ;;  %v100_v30 = vmax.f32 %v92_v25, 0.0 }
  0xcd   :  { %v1216_v28 = vpop.f32.mrf.mxu0 }
  0xce   :  { %v95_v29 = vadd.f32 %v1216_v28, %v1433_v23  ;;  %v98_v32 = vmax.f32 %v84_v27, 0.0 }
  0xcf   :  { %v86_v31 = vpop.f32.mrf.mxu0 }
  0xd0   :  { %v101_v33 = vmax.f32 %v95_v29, 0.0  ;;  %v87_v34 = vadd.f32 %v1433_v23, %v86_v31 }
  0xd2   :  { %v99_v35 = vmax.f32 %v87_v34, 0.0  ;;  %v103_v36 = vpack.c.bf16 %v101_v33, %v100_v30 }
  0xd4   :  { %v102_v37 = vpack.c.bf16 %v99_v35, %v98_v32 }
  0xd6   :  { %1221 = vmatprep.mubr.msk.bf16.mxu1 %vm120_vm1, %v102_v37 }
  0xd7   :  { %1222 = vmatmul.mubr.msk.bf16.vlgmr.msra.gmra.mxu1 %vm120_vm1, %v103_v36 }
  0xd8   :  { %1232 = vmatpush3.bf16.msra.mxu1 %v1393_v7 }
  0xd9   :  { %1233 = vmatprep.subr.bf16.mxu1 %v1398_v8 }
  0xdc   :  { %1234 = vmatpush3.bf16.msra.mxu1 %v1398_v8 }
  0xdd   :  { %1245 = vmatprep.subr.bf16.mxu1 %v1393_v7 }
 0x13b   :  { %v1229_v38 = vpop.f32.mrf.mxu0 }
 0x13c   :  { %v235_v43 = vadd.f32 %v1229_v38, %v1433_v23 }
 0x13d   :  { %v226_v39 = vpop.f32.mrf.mxu0 }
 0x13e   :  { %v227_v41 = vadd.f32 %v1433_v23, %v226_v39  ;;  %v243_v50 = vmax.f32 %v235_v43, 0.0 }
 0x13f   :  { %v1230_v40 = vpop.f32.mrf.mxu0 }
 0x140   :  { %v238_v42 = vadd.f32 %v1230_v40, %v1433_v23  ;;  %v241_v48 = vmax.f32 %v227_v41, 0.0 }
 0x141   :  { %v229_v44 = vpop.f32.mrf.mxu0 }
 0x142   :  { %v230_v45 = vadd.f32 %v1433_v23, %v229_v44  ;;  %v244_v46 = vmax.f32 %v238_v42, 0.0 }
 0x143   :  { %v1243_v47 = vpop.f32.mrf.mxu0 }
 0x144   :  { %v242_v49 = vmax.f32 %v230_v45, 0.0  ;;  %v246_v53 = vpack.c.bf16 %v244_v46, %v243_v50  ;;  %v363_v57 = vadd.f32 %v1243_v47, %v1433_v23 }
 0x145   :  { %v354_v51 = vpop.f32.mrf.mxu0 }
 0x146   :  { %v245_v52 = vpack.c.bf16 %v242_v49, %v241_v48  ;;  %v355_v55 = vadd.f32 %v1433_v23, %v354_v51  ;;  %v371_v0 = vmax.f32 %v363_v57, 0.0 }
 0x147   :  { %v1244_v54 = vpop.f32.mrf.mxu0 }
 0x148   :  { %v366_v56 = vadd.f32 %v1244_v54, %v1433_v23  ;;  %1235 = vmatprep.mubr.msk.bf16.mxu1 %vm120_vm1, %v245_v52  ;;  %v369_v62 = vmax.f32 %v355_v55, 0.0 }
 0x149   :  { %1236 = vmatmul.mubr.msk.bf16.vlgmr.msra.gmra.mxu1 %vm120_vm1, %v246_v53  ;;  %v357_v58 = vpop.f32.mrf.mxu0 }
 0x14a   :  { %v358_v59 = vadd.f32 %v1433_v23, %v357_v58  ;;  %1246 = vmatpush3.bf16.msra.mxu1 %v1393_v7  ;;  %v372_v60 = vmax.f32 %v366_v56, 0.0 }
 0x14b   :  { %v1257_v61 = vpop.f32.mrf.mxu0  ;;  %1247 = vmatprep.subr.bf16.mxu1 %v1398_v8 }
 0x14c   :  { %v370_v63 = vmax.f32 %v358_v59, 0.0  ;;  %v374_v3 = vpack.c.bf16 %v372_v60, %v371_v0  ;;  %v491_v9 = vadd.f32 %v1257_v61, %v1433_v23 }
 0x14d   :  { %v482_v1 = vpop.f32.mrf.mxu0 }
 0x14e   :  { %v373_v2 = vpack.c.bf16 %v370_v63, %v369_v62  ;;  %1248 = vmatpush3.bf16.msra.mxu1 %v1398_v8  ;;  %v483_v5 = vadd.f32 %v1433_v23, %v482_v1  ;;  %v499_v16 = vmax.f32 %v491_v9, 0.0 }
 0x14f   :  { %v1258_v4 = vpop.f32.mrf.mxu0  ;;  %1259 = vmatprep.subr.bf16.mxu1 %v1393_v7 }
 0x150   :  { %v494_v6 = vadd.f32 %v1258_v4, %v1433_v23  ;;  %1249 = vmatprep.mubr.msk.bf16.mxu1 %vm120_vm1, %v373_v2  ;;  %v497_v14 = vmax.f32 %v483_v5, 0.0 }
 0x151   :  { %1250 = vmatmul.mubr.msk.bf16.vlgmr.msra.gmra.mxu1 %vm120_vm1, %v374_v3  ;;  %v485_v10 = vpop.f32.mrf.mxu0 }
 0x152   :  { %v486_v11 = vadd.f32 %v1433_v23, %v485_v10  ;;  %1260 = vmatpush3.bf16.msra.mxu1 %v1393_v7  ;;  %v500_v12 = vmax.f32 %v494_v6, 0.0 }
 0x153   :  { %v1271_v13 = vpop.f32.mrf.mxu0  ;;  %1261 = vmatprep.subr.bf16.mxu1 %v1398_v8 }
 0x154   :  { %v498_v15 = vmax.f32 %v486_v11, 0.0  ;;  %v502_v19 = vpack.c.bf16 %v500_v12, %v499_v16  ;;  %v619_v24 = vadd.f32 %v1271_v13, %v1433_v23 }
 0x155   :  { %v610_v17 = vpop.f32.mrf.mxu0 }
 0x156   :  { %v501_v18 = vpack.c.bf16 %v498_v15, %v497_v14  ;;  %1262 = vmatpush3.bf16.msra.mxu1 %v1398_v8  ;;  %v611_v21 = vadd.f32 %v1433_v23, %v610_v17  ;;  %v627_v31 = vmax.f32 %v619_v24, 0.0 }
 0x157   :  { %v1272_v20 = vpop.f32.mrf.mxu0  ;;  %1273 = vmatprep.subr.bf16.mxu1 %v1393_v7 }
 0x158   :  { %v622_v22 = vadd.f32 %v1272_v20, %v1433_v23  ;;  %1263 = vmatprep.mubr.msk.bf16.mxu1 %vm120_vm1, %v501_v18  ;;  %v625_v29 = vmax.f32 %v611_v21, 0.0 }
 0x159   :  { %1264 = vmatmul.mubr.msk.bf16.vlgmr.msra.gmra.mxu1 %vm120_vm1, %v502_v19  ;;  %v613_v25 = vpop.f32.mrf.mxu0 }
 0x15a   :  { %v614_v26 = vadd.f32 %v1433_v23, %v613_v25  ;;  %1274 = vmatpush3.bf16.msra.mxu1 %v1393_v7  ;;  %v628_v27 = vmax.f32 %v622_v22, 0.0 }
 0x15b   :  { %v1285_v28 = vpop.f32.mrf.mxu0  ;;  %1275 = vmatprep.subr.bf16.mxu1 %v1398_v8 }
 0x15c   :  { %v626_v30 = vmax.f32 %v614_v26, 0.0  ;;  %v630_v34 = vpack.c.bf16 %v628_v27, %v627_v31  ;;  %v747_v38 = vadd.f32 %v1285_v28, %v1433_v23 }
 0x15d   :  { %v738_v32 = vpop.f32.mrf.mxu0 }
 0x15e   :  { %v629_v33 = vpack.c.bf16 %v626_v30, %v625_v29  ;;  %1276 = vmatpush3.bf16.msra.mxu1 %v1398_v8  ;;  %v739_v36 = vadd.f32 %v1433_v23, %v738_v32  ;;  %v755_v45 = vmax.f32 %v747_v38, 0.0  ;;  %v1517_v32 = vld [vmem:[%s1575_s3 + $0x1] ss:$0 sm:$0xff] }
 0x15f   :  { %v1286_v35 = vpop.f32.mrf.mxu0  ;;  %1287 = vmatprep.subr.bf16.mxu1 %v1393_v7 }
 0x160   :  { %v750_v37 = vadd.f32 %v1286_v35, %v1433_v23  ;;  %1277 = vmatprep.mubr.msk.bf16.mxu1 %vm120_vm1, %v629_v33  ;;  %v753_v43 = vmax.f32 %v739_v36, 0.0 }
 0x161   :  { %1278 = vmatmul.mubr.msk.bf16.vlgmr.msra.gmra.mxu1 %vm120_vm1, %v630_v34  ;;  %v741_v39 = vpop.f32.mrf.mxu0 }
 0x162   :  { %v742_v40 = vadd.f32 %v1433_v23, %v741_v39  ;;  %1288 = vmatpush3.bf16.msra.mxu1 %v1393_v7  ;;  %v756_v41 = vmax.f32 %v750_v37, 0.0 }
 0x163   :  { %v1299_v42 = vpop.f32.mrf.mxu0  ;;  %1289 = vmatprep.subr.bf16.mxu1 %v1398_v8 }
 0x164   :  { %v754_v44 = vmax.f32 %v742_v40, 0.0  ;;  %v758_v48 = vpack.c.bf16 %v756_v41, %v755_v45  ;;  %v875_v52 = vadd.f32 %v1299_v42, %v1433_v23 }
 0x165   :  { %v866_v46 = vpop.f32.mrf.mxu0 }
 0x166   :  { %v757_v47 = vpack.c.bf16 %v754_v44, %v753_v43  ;;  %1290 = vmatpush3.bf16.msra.mxu1 %v1398_v8  ;;  %v867_v50 = vadd.f32 %v1433_v23, %v866_v46  ;;  %v883_v59 = vmax.f32 %v875_v52, 0.0 }
 0x167   :  { %v1300_v49 = vpop.f32.mrf.mxu0  ;;  %1301 = vmatprep.subr.bf16.mxu1 %v1393_v7 }
 0x168   :  { %v878_v51 = vadd.f32 %v1300_v49, %v1433_v23  ;;  %1291 = vmatprep.mubr.msk.bf16.mxu1 %vm120_vm1, %v757_v47  ;;  %v881_v57 = vmax.f32 %v867_v50, 0.0 }
 0x169   :  { %1292 = vmatmul.mubr.msk.bf16.vlgmr.msra.gmra.mxu1 %vm120_vm1, %v758_v48  ;;  %v869_v53 = vpop.f32.mrf.mxu0 }
 0x16a   :  { %v870_v54 = vadd.f32 %v1433_v23, %v869_v53  ;;  %1302 = vmatpush3.bf16.msra.mxu1 %v1393_v7  ;;  %v884_v55 = vmax.f32 %v878_v51, 0.0 }
 0x16b   :  { %v1313_v56 = vpop.f32.mrf.mxu0  ;;  %1303 = vmatprep.subr.bf16.mxu1 %v1398_v8 }
 0x16c   :  { %v882_v58 = vmax.f32 %v870_v54, 0.0  ;;  %v886_v62 = vpack.c.bf16 %v884_v55, %v883_v59  ;;  %v1003_v2 = vadd.f32 %v1313_v56, %v1433_v23 }
 0x16d   :  { %v994_v60 = vpop.f32.mrf.mxu0 }
 0x16e   :  { %v885_v61 = vpack.c.bf16 %v882_v58, %v881_v57  ;;  %1304 = vmatpush3.bf16.msra.mxu1 %v1398_v8  ;;  %v995_v0 = vadd.f32 %v1433_v23, %v994_v60  ;;  %v1011_v10 = vmax.f32 %v1003_v2, 0.0 }
 0x16f   :  { %v1314_v63 = vpop.f32.mrf.mxu0  ;;  %1315 = vmatprep.subr.bf16.mxu1 %v1393_v7 }
 0x170   :  { %v1006_v1 = vadd.f32 %v1314_v63, %v1433_v23  ;;  %1305 = vmatprep.mubr.msk.bf16.mxu1 %vm120_vm1, %v885_v61  ;;  %v1009_v6 = vmax.f32 %v995_v0, 0.0 }
 0x171   :  { %1306 = vmatmul.mubr.msk.bf16.vlgmr.msra.gmra.mxu1 %vm120_vm1, %v886_v62  ;;  %v997_v3 = vpop.f32.mrf.mxu0 }
 0x172   :  { %v998_v4 = vadd.f32 %v1433_v23, %v997_v3  ;;  %1316 = vmatpush3.bf16.msra.mxu1 %v1393_v7  ;;  %v1012_v5 = vmax.f32 %v1006_v1, 0.0 }
 0x173   :  { %1317 = vmatprep.subr.bf16.mxu1 %v1398_v8 }
 0x174   :  { %v1010_v9 = vmax.f32 %v998_v4, 0.0  ;;  %v1014_v12 = vpack.c.bf16 %v1012_v5, %v1011_v10 }
 0x176   :  { %v1013_v11 = vpack.c.bf16 %v1010_v9, %v1009_v6  ;;  %1318 = vmatpush3.bf16.msra.mxu1 %v1398_v8 }
 0x178   :  { %1319 = vmatprep.mubr.msk.bf16.mxu1 %vm120_vm1, %v1013_v11 }
 0x179   :  { %1320 = vmatmul.mubr.msk.bf16.vlgmr.msra.gmra.mxu1 %vm120_vm1, %v1014_v12 }
 0x197   :  { %v1223_v13 = vpop.f32.mrf.mxu1 }
 0x198   :  { %v170_v38 = vadd.f32 %v1223_v13, %v1517_v32 }
 0x199   :  { %v161_v14 = vpop.f32.mrf.mxu1 }
 0x19a   :  { %v162_v36 = vadd.f32 %v1517_v32, %v161_v14  ;;  %v178_v52 = vmax.f32 %v170_v38, 0.0 }
 0x19b   :  { %v1224_v15 = vpop.f32.mrf.mxu1 }
 0x19c   :  { %v173_v44 = vadd.f32 %v1224_v15, %v1517_v32  ;;  %v176_v48 = vmax.f32 %v162_v36, 0.0 }
 0x19d   :  { %v164_v23 = vpop.f32.mrf.mxu1 }
 0x19e   :  { %v165_v45 = vadd.f32 %v1517_v32, %v164_v23  ;;  %v179_v61 = vmax.f32 %v173_v44, 0.0 }
 0x1a0   :  { %v177_v62 = vmax.f32 %v165_v45, 0.0 }
 0x209   :  { %v1237_v16 = vpop.f32.mrf.mxu1 }
 0x20a   :  { %v296_v39 = vadd.f32 %v1237_v16, %v1517_v32 }
 0x20b   :  { %v287_v7 = vpop.f32.mrf.mxu1 }
 0x20c   :  { %v288_v34 = vadd.f32 %v1517_v32, %v287_v7  ;;  %v304_v53 = vmax.f32 %v296_v39, 0.0 }
 0x20d   :  { %v1238_v17 = vpop.f32.mrf.mxu1 }
 0x20e   :  { %v302_v42 = vmax.f32 %v288_v34, 0.0  ;;  %v299_v49 = vadd.f32 %v1238_v17, %v1517_v32  ;;  %v308_v6 = vmax.f32 %v178_v52, %v304_v53 }
 0x20f   :  { %v290_v18 = vpop.f32.mrf.mxu1 }
 0x210   :  { %v291_v40 = vadd.f32 %v1517_v32, %v290_v18  ;;  %v306_v57 = vmax.f32 %v176_v48, %v302_v42  ;;  %v305_v2 = vmax.f32 %v299_v49, 0.0 }
 0x211   :  { %v1251_v19 = vpop.f32.mrf.mxu1 }
 0x212   :  { %v303_v54 = vmax.f32 %v291_v40, 0.0  ;;  %v424_v58 = vadd.f32 %v1251_v19, %v1517_v32 }
 0x213   :  { %v415_v20 = vpop.f32.mrf.mxu1 }
 0x214   :  { %v416_v37 = vadd.f32 %v1517_v32, %v415_v20  ;;  %v307_v9 = vmax.f32 %v177_v62, %v303_v54  ;;  %v432_v13 = vmax.f32 %v424_v58, 0.0  ;;  %v309_v20 = vmax.f32 %v179_v61, %v305_v2 }
 0x215   :  { %v1252_v21 = vpop.f32.mrf.mxu1 }
 0x216   :  { %v430_v50 = vmax.f32 %v416_v37, 0.0  ;;  %v427_v16 = vadd.f32 %v1252_v21, %v1517_v32  ;;  %v436_v36 = vmax.f32 %v308_v6, %v432_v13 }
 0x217   :  { %v418_v22 = vpop.f32.mrf.mxu1 }
 0x218   :  { %v419_v46 = vadd.f32 %v1517_v32, %v418_v22  ;;  %v434_v3 = vmax.f32 %v306_v57, %v430_v50  ;;  %v433_v38 = vmax.f32 %v427_v16, 0.0 }
 0x219   :  { %v1265_v24 = vpop.f32.mrf.mxu1 }
 0x21a   :  { %v431_v63 = vmax.f32 %v419_v46, 0.0  ;;  %v552_v10 = vadd.f32 %v1265_v24, %v1517_v32  ;;  %v437_v54 = vmax.f32 %v309_v20, %v433_v38 }
 0x21b   :  { %v543_v25 = vpop.f32.mrf.mxu1 }
 0x21c   :  { %v544_v43 = vadd.f32 %v1517_v32, %v543_v25  ;;  %v435_v7 = vmax.f32 %v307_v9, %v431_v63  ;;  %v560_v24 = vmax.f32 %v552_v10, 0.0 }
 0x21d   :  { %v1510_v8 = vpop.f32.mrf.mxu1 }
 0x21e   :  { %v558_v59 = vmax.f32 %v544_v43, 0.0  ;;  %v564_v46 = vmax.f32 %v436_v36, %v560_v24 }
 0x21f   :  { %v546_v26 = vpop.f32.mrf.mxu1 }
 0x220   :  { %v547_v55 = vadd.f32 %v1517_v32, %v546_v26  ;;  %v562_v14 = vmax.f32 %v434_v3, %v558_v59 }
 0x221   :  { %v1279_v27 = vpop.f32.mrf.mxu1 }
 0x222   :  { %v559_v11 = vmax.f32 %v547_v55, 0.0  ;;  %v680_v17 = vadd.f32 %v1279_v27, %v1517_v32 }
 0x223   :  { %v671_v28 = vpop.f32.mrf.mxu1 }
 0x224   :  { %v672_v51 = vadd.f32 %v1517_v32, %v671_v28  ;;  %v555_v28 = vadd.f32 %v1510_v8, %v1517_v32  ;;  %v688_v39 = vmax.f32 %v680_v17, 0.0 }
 0x225   :  { %v1512_v29 = vpop.f32.mrf.mxu1 }
 0x226   :  { %v686_v4 = vmax.f32 %v672_v51, 0.0  ;;  %v683_v40 = vadd.f32 %v1512_v29, %v1517_v32  ;;  %v692_v55 = vmax.f32 %v564_v46, %v688_v39 }
 0x227   :  { %v674_v30 = vpop.f32.mrf.mxu1 }
 0x228   :  { %v675_v0 = vadd.f32 %v1517_v32, %v674_v30  ;;  %v690_v22 = vmax.f32 %v562_v14, %v686_v4  ;;  %v563_v30 = vmax.f32 %v435_v7, %v559_v11 }
 0x229   :  { %v1293_v31 = vpop.f32.mrf.mxu1 }
 0x22a   :  { %v687_v18 = vmax.f32 %v675_v0, 0.0 }
 0x22b   :  { %v799_v33 = vpop.f32.mrf.mxu1 }
 0x22c   :  { %v800_v60 = vadd.f32 %v1517_v32, %v799_v33  ;;  %v808_v33 = vadd.f32 %v1293_v31, %v1517_v32  ;;  %v561_v31 = vmax.f32 %v555_v28, 0.0 }
 0x22d   :  { %v1520_v35 = vpop.f32.mrf.mxu1 }
 0x22e   :  { %v814_v15 = vmax.f32 %v800_v60, 0.0  ;;  %v816_v48 = vmax.f32 %v808_v33, 0.0  ;;  %v811_v49 = vadd.f32 %v1520_v35, %v1517_v32  ;;  %v565_v60 = vmax.f32 %v437_v54, %v561_v31 }
 0x22f   :  { %v802_v41 = vpop.f32.mrf.mxu1 }
 0x230   :  { %v803_v23 = vadd.f32 %v1517_v32, %v802_v41  ;;  %v818_v21 = vmax.f32 %v690_v22, %v814_v15  ;;  %v691_v41 = vmax.f32 %v563_v30, %v687_v18  ;;  %v820_v61 = vmax.f32 %v692_v55, %v816_v48 }
 0x231   :  { %v1307_v47 = vpop.f32.mrf.mxu1  ;;  %v817_v62 = vmax.f32 %v811_v49, 0.0 }
 0x232   :  { %v815_v37 = vmax.f32 %v803_v23, 0.0  ;;  %v936_v43 = vadd.f32 %v1307_v47, %v1517_v32 }
 0x233   :  { %v927_v56 = vpop.f32.mrf.mxu1 }
 0x234   :  { %v928_v5 = vadd.f32 %v1517_v32, %v927_v56  ;;  %v819_v51 = vmax.f32 %v691_v41, %v815_v37  ;;  %v689_v56 = vmax.f32 %v683_v40, 0.0  ;;  %v944_v47 = vmax.f32 %v936_v43, 0.0 }
 0x235   :  { %v1308_v1 = vpop.f32.mrf.mxu1 }
 0x236   :  { %v942_v25 = vmax.f32 %v928_v5, 0.0  ;;  %v939_v57 = vadd.f32 %v1308_v1, %v1517_v32  ;;  %v693_v2 = vmax.f32 %v565_v60, %v689_v56  ;;  %v948_v3 = vmax.f32 %v820_v61, %v944_v47 }
 0x237   :  { %v930_v12 = vpop.f32.mrf.mxu1 }
 0x238   :  { %v931_v26 = vadd.f32 %v1517_v32, %v930_v12  ;;  %v946_v44 = vmax.f32 %v818_v21, %v942_v25  ;;  %v945_v4 = vmax.f32 %v939_v57, 0.0  ;;  %v821_v5 = vmax.f32 %v693_v2, %v817_v62 }
 0x239   :  { %v1321_v19 = vpop.f32.mrf.mxu1 }
 0x23a   :  { %v943_v8 = vmax.f32 %v931_v26, 0.0  ;;  %v1064_v52 = vadd.f32 %v1321_v19, %v1517_v32  ;;  %v949_v10 = vmax.f32 %v821_v5, %v945_v4 }
 0x23b   :  { %v1055_v34 = vpop.f32.mrf.mxu1 }
 0x23c   :  { %v1056_v27 = vadd.f32 %v1517_v32, %v1055_v34  ;;  %v947_v58 = vmax.f32 %v819_v51, %v943_v8  ;;  %v1072_v35 = vmax.f32 %v1064_v52, 0.0 }
 0x23d   :  { %v1322_v42 = vpop.f32.mrf.mxu1 }
 0x23e   :  { %v1070_v45 = vmax.f32 %v1056_v27, 0.0  ;;  %v1067_v63 = vadd.f32 %v1322_v42, %v1517_v32  ;;  %v1076_v6 = vmax.f32 %v948_v3, %v1072_v35 }
 0x23f   :  { %v1058_v50 = vpop.f32.mrf.mxu1 }
 0x240   :  { %v1059_v53 = vadd.f32 %v1517_v32, %v1058_v50  ;;  %v1074_v29 = vmax.f32 %v946_v44, %v1070_v45  ;;  %v1073_v9 = vmax.f32 %v1067_v63, 0.0 }
 0x242   :  { %v1071_v59 = vmax.f32 %v1059_v53, 0.0  ;;  %1078 = vxpose.xlu0.b32.start [1/4] (short) (narrow) %v1074_v29, 32  ;;  %v1077_v1 = vmax.f32 %v949_v10, %v1073_v9 }
 0x244   :  { %v1075_v0 = vmax.f32 %v947_v58, %v1071_v59 }
 0x246   :  { %1079 = vxpose.xlu0.b32.cont [2/4] (short) (narrow) %v1075_v0, 32 }
 0x24a   :  { %1080 = vxpose.xlu0.b32.cont [3/4] (short) (narrow) %v1076_v6, 32 }
 0x24e   :  { %1081 = vxpose.xlu0.b32.end [4/4] (short) (narrow) %v1077_v1, 32 }
 0x2be   :  { %v1094_v11 = vpop.trf.xlu0 }
 0x2bf   :  { %1110 = vst.msk [vmem:[%s1576_s4] sm:$0xff] %vm120_vm1, %v1094_v11 }
 0x2c2   :  { %v1095_v12 = vpop.trf.xlu0 }
 0x2c3   :  { %1111 = vst.msk [vmem:[%s1576_s4 + $0x8] sm:$0xff] %vm120_vm1, %v1095_v12 }
 0x2c6   :  { %v1096_v32 = vpop.trf.xlu0 }
 0x2c7   :  { %1112 = vst.msk [vmem:[%s1576_s4 + $0x10] sm:$0xff] %vm120_vm1, %v1096_v32 }
 0x2ca   :  { %v1097_v13 = vpop.trf.xlu0 }
 0x2cb   :  { %1113 = vst.msk [vmem:[%s1576_s4 + $0x18] sm:$0xff] %vm120_vm1, %v1097_v13 }

</bundles_post_ra>
